<compile_context>
chip_gen: v5e
topology: v5e:2x2
jax: 0.10.0
libtpu: 0.0.40
codegen_flags: <defaults>
</compile_context>

<pallas_src>
import functools

import jax
import jax.numpy as jnp
from jax.experimental import pallas as pl
from jax.experimental.pallas import tpu as pltpu


def _round_up(x, m):
    return (x + m - 1) // m * m


def _frelu_kernel(x_ref, p_ref, m_ref, o_ref, *, width):
    """One row-tile per grid step.

    x_ref : (TR, HWp)   input rows (one row = one (batch, channel) plane)
    p_ref : (TR, 10)    per-row params: 9 BN-scaled conv taps + folded bias
    m_ref : (9,  HWp)   per-tap {0,1} validity masks (resident across steps)
    o_ref : (TR, HWp)
    """
    x = x_ref[...].astype(jnp.float32)              # single block load
    params = p_ref[...].astype(jnp.float32)         # hoisted weight load
    masks = m_ref[...]                               # resident, f32 {0,1}
    hwp = x.shape[1]

    # Pre-stage the per-tap scale columns outside the 3x3 loop.
    taps = [params[:, k:k + 1] for k in range(9)]    # each (TR, 1)
    bias = params[:, 9:10]                           # (TR, 1)

    # Centre tap: no shift, no edge mask -- initializes the accumulator.
    acc = x * taps[4]

    # Remaining 8 taps: lane rotation (XLU) + mask-mul + tap-mul + add (VPU).
    # rolled[p] = x[(p + d) % HWp]; the mask zeroes every output position
    # whose source pixel falls outside the HxW image (zero-padding halo),
    # which also covers every wrapped-around lane.
    for kh in range(3):
        for kw in range(3):
            dh, dw = kh - 1, kw - 1
            if dh == 0 and dw == 0:
                continue
            k = kh * 3 + kw
            d = dh * width + dw
            rolled = pltpu.roll(x, shift=(-d) % hwp, axis=1)
            acc = acc + (rolled * masks[k:k + 1, :]) * taps[k]

    o_ref[...] = jnp.maximum(x, acc + bias).astype(o_ref.dtype)


def _pick_row_tile(rows_p, hwp, itemsize, target_bytes=2 * 1024 * 1024):
    """Pick a row tile TR (multiple of 8, divides rows_p) with one (TR, HWp)
    block <= target_bytes; prefer >= 2 grid steps so both v7x cores work."""
    cap = max(8, (target_bytes // (hwp * itemsize)) // 8 * 8)
    divisors = [t for t in range(8, rows_p + 1, 8) if rows_p % t == 0]
    fitting = [t for t in divisors if t <= cap] or [8]
    multi = [t for t in fitting if rows_p // t >= 2]
    return max(multi) if multi else max(fitting)


def frelu_pallas(x_nchw, w_dw, gamma, beta, running_mean, running_var, eps=1e-5):
    """x_nchw: (N, C, H, W).  w_dw: (C, 3, 3) depthwise conv weights."""
    n, c, h, w = x_nchw.shape
    hw = h * w
    hwp = _round_up(hw, 128)          # lane-dense output (unmasked vst)
    rows = n * c
    rows_p = _round_up(rows, 8)       # sublane-dense vregs

    # Fold inference-mode BN into the conv taps (scale) and a per-channel bias.
    scale = gamma / jnp.sqrt(running_var + eps)                       # (C,)
    bias = beta - running_mean * scale                                # (C,)
    params_c = jnp.concatenate(
        [(w_dw * scale[:, None, None]).reshape(c, 9), bias[:, None]],
        axis=1).astype(jnp.float32)                                   # (C, 10)
    params = jnp.tile(params_c, (n, 1))                               # (N*C, 10)
    if rows_p != rows:
        params = jnp.pad(params, ((0, rows_p - rows), (0, 0)))

    # Per-tap validity masks of the zero-padded 3x3 stencil, built once on
    # the host side and kept resident in VMEM by a constant index_map.
    pos = jnp.arange(hw)
    row_idx = pos // w
    col_idx = pos % w
    mask_rows = []
    for kh in range(3):
        for kw in range(3):
            dh, dw = kh - 1, kw - 1
            valid = ((row_idx + dh >= 0) & (row_idx + dh < h) &
                     (col_idx + dw >= 0) & (col_idx + dw < w))
            mask_rows.append(valid)
    masks = jnp.stack(mask_rows).astype(jnp.float32)                  # (9, hw)
    if hwp != hw:
        masks = jnp.pad(masks, ((0, 0), (0, hwp - hw)))

    # Free, contiguous reshape: one row per (batch, channel) plane.
    x2d = x_nchw.reshape(rows, hw)
    if hwp != hw or rows_p != rows:
        x2d = jnp.pad(x2d, ((0, rows_p - rows), (0, hwp - hw)))

    tr = _pick_row_tile(rows_p, hwp, x2d.dtype.itemsize)
    grid = (rows_p // tr,)

    out2d = pl.pallas_call(
        functools.partial(_frelu_kernel, width=w),
        out_shape=jax.ShapeDtypeStruct((rows_p, hwp), x_nchw.dtype),
        grid=grid,
        in_specs=[
            pl.BlockSpec((tr, hwp), lambda i: (i, 0)),
            pl.BlockSpec((tr, 10), lambda i: (i, 0)),
            pl.BlockSpec((9, hwp), lambda i: (0, 0)),   # resident masks
        ],
        out_specs=pl.BlockSpec((tr, hwp), lambda i: (i, 0)),
        compiler_params=pltpu.CompilerParams(
            dimension_semantics=("parallel",)),
    )(x2d, params, masks)

    return out2d[:rows, :hw].reshape(n, c, h, w)


def frelu_reference(x_nchw, w_dw, gamma, beta, running_mean, running_var, eps=1e-5):
    """Pure-JAX reference (depthwise conv via lax.conv_general_dilated)."""
    c = x_nchw.shape[1]
    wk = w_dw.reshape(c, 1, 3, 3)
    conv = jax.lax.conv_general_dilated(
        x_nchw, wk, window_strides=(1, 1), padding=((1, 1), (1, 1)),
        dimension_numbers=("NCHW", "OIHW", "NCHW"), feature_group_count=c,
        precision=jax.lax.Precision.HIGHEST)
    scale = (gamma / jnp.sqrt(running_var + eps)).reshape(1, c, 1, 1)
    bias = (beta - running_mean * gamma / jnp.sqrt(running_var + eps)).reshape(1, c, 1, 1)
    return jnp.maximum(x_nchw, conv * scale + bias)


if __name__ == "__main__":
    key = jax.random.PRNGKey(0)
    N, C, H, W = 2, 4, 16, 16

    k_x, k_w, k_g, k_b, k_m, k_v = jax.random.split(key, 6)
    x = jax.random.normal(k_x, (N, C, H, W), jnp.float32)
    # Conv2d(C, C, 3, groups=C, bias=False) -> weight (C, 1, 3, 3); stored (C, 3, 3).
    w_dw = jax.random.normal(k_w, (C, 3, 3), jnp.float32) * 0.3
    gamma = jax.random.normal(k_g, (C,), jnp.float32) * 0.1 + 1.0
    beta = jax.random.normal(k_b, (C,), jnp.float32) * 0.1
    running_mean = jax.random.normal(k_m, (C,), jnp.float32) * 0.1
    running_var = jax.random.uniform(k_v, (C,), jnp.float32, 0.5, 1.5)

    out = frelu_pallas(x, w_dw, gamma, beta, running_mean, running_var)
    out = jax.block_until_ready(out)

    ref = frelu_reference(x, w_dw, gamma, beta, running_mean, running_var)
    ref = jax.block_until_ready(ref)

    assert out.shape == (N, C, H, W)
    assert jnp.allclose(out, ref, atol=1e-5, rtol=1e-5), "mismatch vs reference"
    print("KERNEL_OK")
</pallas_src>

<mosaic_0001>
module attributes {stable_mosaic.version = 11 : i64} {
  func.func @_frelu_kernel(%arg0: i32, %arg1: memref<8x256xf32, #tpu.memory_space<vmem>>, %arg2: memref<8x10xf32, #tpu.memory_space<vmem>>, %arg3: memref<9x256xf32, #tpu.memory_space<vmem>>, %arg4: memref<8x256xf32, #tpu.memory_space<vmem>>) attributes {dimension_semantics = [#tpu.dimension_semantics<parallel>], iteration_bounds = array<i64: 1>, scalar_prefetch = 0 : i64, scratch_operands = 0 : i64, tpu.core_type = #tpu.core_type<tc>, window_params = [{transform_indices = @transform_0, window_bounds = array<i64: 8, 256>}, {transform_indices = @transform_1, window_bounds = array<i64: 8, 10>}, {pipeline_mode = #tpu.pipeline_mode<synchronous>, transform_indices = @transform_2, window_bounds = array<i64: 9, 256>}, {transform_indices = @transform_3, window_bounds = array<i64: 8, 256>}]} {
    %c0 = arith.constant 0 : index
    %c0_0 = arith.constant 0 : index
    %0 = vector.load %arg1[%c0, %c0_0] : memref<8x256xf32, #tpu.memory_space<vmem>>, vector<8x256xf32>
    %c0_1 = arith.constant 0 : index
    %c0_2 = arith.constant 0 : index
    %1 = vector.load %arg2[%c0_1, %c0_2] : memref<8x10xf32, #tpu.memory_space<vmem>>, vector<8x10xf32>
    %c0_3 = arith.constant 0 : index
    %c0_4 = arith.constant 0 : index
    %2 = vector.load %arg3[%c0_3, %c0_4] : memref<9x256xf32, #tpu.memory_space<vmem>>, vector<9x256xf32>
    %3 = vector.extract_strided_slice %1 {offsets = [0, 0], sizes = [8, 1], strides = [1, 1]} : vector<8x10xf32> to vector<8x1xf32>
    %4 = vector.extract_strided_slice %1 {offsets = [0, 1], sizes = [8, 1], strides = [1, 1]} : vector<8x10xf32> to vector<8x1xf32>
    %5 = vector.extract_strided_slice %1 {offsets = [0, 2], sizes = [8, 1], strides = [1, 1]} : vector<8x10xf32> to vector<8x1xf32>
    %6 = vector.extract_strided_slice %1 {offsets = [0, 3], sizes = [8, 1], strides = [1, 1]} : vector<8x10xf32> to vector<8x1xf32>
    %7 = vector.extract_strided_slice %1 {offsets = [0, 4], sizes = [8, 1], strides = [1, 1]} : vector<8x10xf32> to vector<8x1xf32>
    %8 = vector.extract_strided_slice %1 {offsets = [0, 5], sizes = [8, 1], strides = [1, 1]} : vector<8x10xf32> to vector<8x1xf32>
    %9 = vector.extract_strided_slice %1 {offsets = [0, 6], sizes = [8, 1], strides = [1, 1]} : vector<8x10xf32> to vector<8x1xf32>
    %10 = vector.extract_strided_slice %1 {offsets = [0, 7], sizes = [8, 1], strides = [1, 1]} : vector<8x10xf32> to vector<8x1xf32>
    %11 = vector.extract_strided_slice %1 {offsets = [0, 8], sizes = [8, 1], strides = [1, 1]} : vector<8x10xf32> to vector<8x1xf32>
    %12 = vector.extract_strided_slice %1 {offsets = [0, 9], sizes = [8, 1], strides = [1, 1]} : vector<8x10xf32> to vector<8x1xf32>
    %13 = vector.broadcast %7 : vector<8x1xf32> to vector<8x256xf32>
    %14 = arith.mulf %0, %13 : vector<8x256xf32>
    %c17_i32 = arith.constant 17 : i32
    %15 = tpu.dynamic_rotate %0 by %c17_i32 dim 1 : vector<8x256xf32>, i32 -> vector<8x256xf32>
    %16 = vector.extract_strided_slice %2 {offsets = [0, 0], sizes = [1, 256], strides = [1, 1]} : vector<9x256xf32> to vector<1x256xf32>
    %17 = vector.broadcast %16 : vector<1x256xf32> to vector<8x256xf32>
    %18 = arith.mulf %15, %17 : vector<8x256xf32>
    %19 = vector.broadcast %3 : vector<8x1xf32> to vector<8x256xf32>
    %20 = arith.mulf %18, %19 : vector<8x256xf32>
    %21 = arith.addf %14, %20 : vector<8x256xf32>
    %c16_i32 = arith.constant 16 : i32
    %22 = tpu.dynamic_rotate %0 by %c16_i32 dim 1 : vector<8x256xf32>, i32 -> vector<8x256xf32>
    %23 = vector.extract_strided_slice %2 {offsets = [1, 0], sizes = [1, 256], strides = [1, 1]} : vector<9x256xf32> to vector<1x256xf32>
    %24 = vector.broadcast %23 : vector<1x256xf32> to vector<8x256xf32>
    %25 = arith.mulf %22, %24 : vector<8x256xf32>
    %26 = vector.broadcast %4 : vector<8x1xf32> to vector<8x256xf32>
    %27 = arith.mulf %25, %26 : vector<8x256xf32>
    %28 = arith.addf %21, %27 : vector<8x256xf32>
    %c15_i32 = arith.constant 15 : i32
    %29 = tpu.dynamic_rotate %0 by %c15_i32 dim 1 : vector<8x256xf32>, i32 -> vector<8x256xf32>
    %30 = vector.extract_strided_slice %2 {offsets = [2, 0], sizes = [1, 256], strides = [1, 1]} : vector<9x256xf32> to vector<1x256xf32>
    %31 = vector.broadcast %30 : vector<1x256xf32> to vector<8x256xf32>
    %32 = arith.mulf %29, %31 : vector<8x256xf32>
    %33 = vector.broadcast %5 : vector<8x1xf32> to vector<8x256xf32>
    %34 = arith.mulf %32, %33 : vector<8x256xf32>
    %35 = arith.addf %28, %34 : vector<8x256xf32>
    %c1_i32 = arith.constant 1 : i32
    %36 = tpu.dynamic_rotate %0 by %c1_i32 dim 1 : vector<8x256xf32>, i32 -> vector<8x256xf32>
    %37 = vector.extract_strided_slice %2 {offsets = [3, 0], sizes = [1, 256], strides = [1, 1]} : vector<9x256xf32> to vector<1x256xf32>
    %38 = vector.broadcast %37 : vector<1x256xf32> to vector<8x256xf32>
    %39 = arith.mulf %36, %38 : vector<8x256xf32>
    %40 = vector.broadcast %6 : vector<8x1xf32> to vector<8x256xf32>
    %41 = arith.mulf %39, %40 : vector<8x256xf32>
    %42 = arith.addf %35, %41 : vector<8x256xf32>
    %c255_i32 = arith.constant 255 : i32
    %43 = tpu.dynamic_rotate %0 by %c255_i32 dim 1 : vector<8x256xf32>, i32 -> vector<8x256xf32>
    %44 = vector.extract_strided_slice %2 {offsets = [5, 0], sizes = [1, 256], strides = [1, 1]} : vector<9x256xf32> to vector<1x256xf32>
    %45 = vector.broadcast %44 : vector<1x256xf32> to vector<8x256xf32>
    %46 = arith.mulf %43, %45 : vector<8x256xf32>
    %47 = vector.broadcast %8 : vector<8x1xf32> to vector<8x256xf32>
    %48 = arith.mulf %46, %47 : vector<8x256xf32>
    %49 = arith.addf %42, %48 : vector<8x256xf32>
    %c241_i32 = arith.constant 241 : i32
    %50 = tpu.dynamic_rotate %0 by %c241_i32 dim 1 : vector<8x256xf32>, i32 -> vector<8x256xf32>
    %51 = vector.extract_strided_slice %2 {offsets = [6, 0], sizes = [1, 256], strides = [1, 1]} : vector<9x256xf32> to vector<1x256xf32>
    %52 = vector.broadcast %51 : vector<1x256xf32> to vector<8x256xf32>
    %53 = arith.mulf %50, %52 : vector<8x256xf32>
    %54 = vector.broadcast %9 : vector<8x1xf32> to vector<8x256xf32>
    %55 = arith.mulf %53, %54 : vector<8x256xf32>
    %56 = arith.addf %49, %55 : vector<8x256xf32>
    %c240_i32 = arith.constant 240 : i32
    %57 = tpu.dynamic_rotate %0 by %c240_i32 dim 1 : vector<8x256xf32>, i32 -> vector<8x256xf32>
    %58 = vector.extract_strided_slice %2 {offsets = [7, 0], sizes = [1, 256], strides = [1, 1]} : vector<9x256xf32> to vector<1x256xf32>
    %59 = vector.broadcast %58 : vector<1x256xf32> to vector<8x256xf32>
    %60 = arith.mulf %57, %59 : vector<8x256xf32>
    %61 = vector.broadcast %10 : vector<8x1xf32> to vector<8x256xf32>
    %62 = arith.mulf %60, %61 : vector<8x256xf32>
    %63 = arith.addf %56, %62 : vector<8x256xf32>
    %c239_i32 = arith.constant 239 : i32
    %64 = tpu.dynamic_rotate %0 by %c239_i32 dim 1 : vector<8x256xf32>, i32 -> vector<8x256xf32>
    %65 = vector.extract_strided_slice %2 {offsets = [8, 0], sizes = [1, 256], strides = [1, 1]} : vector<9x256xf32> to vector<1x256xf32>
    %66 = vector.broadcast %65 : vector<1x256xf32> to vector<8x256xf32>
    %67 = arith.mulf %64, %66 : vector<8x256xf32>
    %68 = vector.broadcast %11 : vector<8x1xf32> to vector<8x256xf32>
    %69 = arith.mulf %67, %68 : vector<8x256xf32>
    %70 = arith.addf %63, %69 : vector<8x256xf32>
    %71 = vector.broadcast %12 : vector<8x1xf32> to vector<8x256xf32>
    %72 = arith.addf %70, %71 : vector<8x256xf32>
    %73 = arith.maximumf %0, %72 : vector<8x256xf32>
    %c0_5 = arith.constant 0 : index
    %c0_6 = arith.constant 0 : index
    %74 = vector.load %arg4[%c0_5, %c0_6] : memref<8x256xf32, #tpu.memory_space<vmem>>, vector<8x256xf32>
    tpu.vector_store %arg4[%c0_5, %c0_6], %73 {strides = array<i32>} : memref<8x256xf32, #tpu.memory_space<vmem>>, vector<8x256xf32>,
    return
  }
  func.func @transform_0(%arg0: i32) -> (i32, i32) {
    %c0_i32 = arith.constant 0 : i32
    %c0_i32_0 = arith.constant 0 : i32
    return %arg0, %c0_i32 : i32, i32
  }
  func.func @transform_1(%arg0: i32) -> (i32, i32) {
    %c0_i32 = arith.constant 0 : i32
    %c0_i32_0 = arith.constant 0 : i32
    return %arg0, %c0_i32 : i32, i32
  }
  func.func @transform_2(%arg0: i32) -> (i32, i32) {
    %c0_i32 = arith.constant 0 : i32
    %c0_i32_0 = arith.constant 0 : i32
    %c0_i32_1 = arith.constant 0 : i32
    return %c0_i32, %c0_i32_0 : i32, i32
  }
  func.func @transform_3(%arg0: i32) -> (i32, i32) {
    %c0_i32 = arith.constant 0 : i32
    %c0_i32_0 = arith.constant 0 : i32
    return %arg0, %c0_i32 : i32, i32
  }
}

</mosaic_0001>

<bundles_post_ra>
// kernel: tpu_custom_call.1
= control target key start
LH: loop header
LB: loop body
LE: loop exit
PB: predicated region body
PF: predicated region fallthrough
CT: control target
= control target key end

     0   :  { %8 = vsyncpa [#allocation3], 0  ;;  %s518_s0 = inlined_call_operand.hbm [shape: f32[8,256], index: 0, kind: input, shape index: {}]   ;;  %s519_s1 = inlined_call_operand.hbm [shape: f32[8,10], index: 1, kind: input, shape index: {}]   ;;  %s520_s2 = inlined_call_operand.hbm [shape: f32[9,256], index: 2, kind: input, shape index: {}]   ;;  %s521_s3 = inlined_call_operand.hbm [shape: f32[8,256], index: 3, kind: output, shape index: {}]  }
   0x1   :  { %9 = vsyncpa [#allocation6], 0  ;;  %s27_s14 = sshll.u32 %s519_s1, 4  ;;  %s28_s14 = int_to_ptr.hbm [resolvable:$true] %s27_s14 }
   0x2   :  { %10 = vsyncpa [#allocation4], 0  ;;  %s391_s15 = smov [#allocation5]   ;;  %s16_s19 = sshll.u32 %s518_s0, 4  ;;  %s17_s19 = int_to_ptr.hbm [resolvable:$true] %s16_s19 }
   0x3   :  { %s29_s16 = sshll.u32 %s391_s15, 4  ;;  %s392_s20 = smov [#allocation2]   ;;  %s30_s16 = int_to_ptr.vmem [resolvable:$true] %s29_s16 }
   0x4   :  { %32 = dma.hbm_to_vmem [thread:$0]  %s28_s14, 128, %s30_s16, [#allocation6]  }
   0x5   :  { %s18_s21 = sshll.u32 %s392_s20, 4  ;;  %s37_s24 = sshll.u32 %s520_s2, 4  ;;  %s19_s21 = int_to_ptr.vmem [resolvable:$true] %s18_s21  ;;  %s38_s24 = int_to_ptr.hbm [resolvable:$true] %s37_s24 }
   0x6   :  { %21 = dma.hbm_to_vmem [thread:$0]  %s17_s19, 256, %s19_s21, [#allocation3]  }
   0x7   :  { %s393_s1 = smov [#allocation7]   ;;  %s394_s26 = smov 256  }
   0x8   :  { %s39_s25 = sshll.u32 %s393_s1, 4  ;;  %s395_s27 = smov 16   ;;  %s40_s25 = int_to_ptr.vmem [resolvable:$true] %s39_s25 }
   0x9   :  { %45 = dma.hbm_to_vmem [thread:$0]  %s38_s24, 512, %s40_s25, [#allocation6], %s394_s26, %s394_s26, %s395_s27  }
   0xa   :  { %385 = dma.done.wait [#allocation3], 256  }
   0xb   :  { %386 = vsyncadd [#allocation3], 4294967040 }
   0xc   :  { %387 = dma.done.wait [#allocation6], 640  }
   0xd   :  { %388 = vsyncadd [#allocation6], 4294966656  ;;  %v396_v0 = vmov 4   ;;  %v397_v1 = vmov 0   ;;  %v60_v2 = vld [vmem:[#allocation5] sm:$0xff]  ;;  %v443_v3 = vld [vmem:[#allocation2 + $0x8] sm:$0xff]  ;;  %v76_v27 = vlaneseq }
   0xe   :  { %277 = vset.pattern.permute.xlu0 %v396_v0  ;;  %278 = vset.pattern.permute.xlu1 %v397_v1  ;;  %s398_s0 = smov 17   ;;  %v446_v4 = vld [vmem:[#allocation2] sm:$0xff]  ;;  %v399_v5 = vmov 1   ;;  %s400_s2 = smov 15   ;;  %v401_v6 = vmov 2   ;;  %v403_v7 = vmov 5  }
   0xf   :  { %67 = vperm.xlu0 %277, %v60_v2   ;;  %74 = vrot.lane.b32.xlu1 %v443_v3, %s398_s0  ;;  %s402_s28 = smov 1   ;;  %v404_v8 = vmov 3   ;;  %s405_s29 = smov 127   ;;  %v406_v9 = vmov 8   ;;  %v408_v10 = vmov 6   ;;  %v411_v11 = vmov 9  }
  0x10   :  { %93 = vrot.lane.b32.xlu2 %v446_v4, %s395_s27  ;;  %s407_s30 = smov 113   ;;  %s409_s4 = smov 111   ;;  %v412_v12 = vmov 7   ;;  %v467_v29 = vand.u32 127, %v76_v27  ;;  %v470_v30 = vld [vmem:[#allocation7] sm:$0xff]  ;;  %v472_v31 = vld [vmem:[#allocation7 + $0x8] sm:$0xff] }
  0x11   :  { %285 = vset.pattern.permute.xlu2 %v406_v9  ;;  %s410_s5 = smov 112   ;;  %v81_v34 = vperm.slane %v470_v30, 0  ;;  %v82_v35 = vperm.slane %v472_v31, 0  ;;  %v100_v38 = vperm.slane %v470_v30, 1  ;;  %v101_v39 = vperm.slane %v472_v31, 1  ;;  %s413_s6 = smov [#allocation8]  }
  0x12   :  { %vm78_vm0 = vcmp.lt.s32.totalorder %v467_v29, 17  ;;  %vm97_vm1 = vcmp.lt.s32.totalorder %v467_v29, 16  ;;  %vm116_vm2 = vcmp.lt.s32.totalorder %v467_v29, 15  ;;  %v119_v47 = vperm.slane %v470_v30, 2  ;;  %s241_s7 = sshll.u32 %s413_s6, 4  ;;  %s243_s10 = sshll.u32 %s521_s3, 4  ;;  %s242_s7 = int_to_ptr.vmem [resolvable:$true] %s241_s7  ;;  %s244_s10 = int_to_ptr.hbm [resolvable:$true] %s243_s10 }
  0x13   :  { %v120_v48 = vperm.slane %v472_v31, 2  ;;  %vm135_vm3 = vcmp.lt.s32.totalorder %v467_v29, 1  ;;  %vm154_vm4 = vcmp.lt.s32.totalorder %v467_v29, 127  ;;  %v138_v56 = vperm.slane %v470_v30, 3 }
  0x14   :  { %v139_v57 = vperm.slane %v472_v31, 3  ;;  %v157_v58 = vperm.slane %v470_v30, 5  ;;  %v158_v59 = vperm.slane %v472_v31, 5  ;;  %vm173_vm5 = vcmp.lt.s32.totalorder %v467_v29, 113 }
  0x15   :  { %vm192_vm6 = vcmp.lt.s32.totalorder %v467_v29, 112  ;;  %vm211_vm7 = vcmp.lt.s32.totalorder %v467_v29, 111 }
  0x17   :  { %86 = vperm.xlu1 %278, %v60_v2   ;;  %72 = vrot.lane.b32.xlu0 %v446_v4, %s398_s0 }
  0x18   :  { %279 = vset.pattern.permute.xlu0 %v399_v5  ;;  %95 = vrot.lane.b32.xlu2 %v443_v3, %s395_s27 }
  0x1f   :  { %112 = vrot.lane.b32.xlu1 %v446_v4, %s400_s2  ;;  %105 = vperm.xlu0 %279, %v60_v2  }
  0x20   :  { %280 = vset.pattern.permute.xlu1 %v401_v6  ;;  %114 = vrot.lane.b32.xlu2 %v443_v3, %s400_s2 }
  0x27   :  { %124 = vperm.xlu1 %280, %v60_v2   ;;  %133 = vrot.lane.b32.xlu0 %v443_v3, %s402_s28 }
  0x28   :  { %282 = vset.pattern.permute.xlu0 %v403_v7  ;;  %131 = vrot.lane.b32.xlu2 %v446_v4, %s402_s28 }
  0x2f   :  { %281 = vset.pattern.permute.xlu1 %v404_v8  ;;  %152 = vrot.lane.b32.xlu0 %v443_v3, %s405_s29 }
  0x30   :  { %143 = vperm.xlu1 %281, %v60_v2   ;;  %150 = vrot.lane.b32.xlu2 %v446_v4, %s405_s29 }
  0x37   :  { %162 = vperm.xlu0 %282, %v60_v2  }
  0x38   :  { %169 = vrot.lane.b32.xlu1 %v446_v4, %s407_s30  ;;  %171 = vrot.lane.b32.xlu2 %v443_v3, %s407_s30 }
  0x39   :  { %283 = vset.pattern.permute.xlu1 %v408_v10 }
  0x3f   :  { %209 = vrot.lane.b32.xlu0 %v443_v3, %s409_s4 }
  0x40   :  { %188 = vrot.lane.b32.xlu1 %v446_v4, %s410_s5  ;;  %190 = vrot.lane.b32.xlu2 %v443_v3, %s410_s5 }
  0x41   :  { %286 = vset.pattern.permute.xlu0 %v411_v11 }
  0x47   :  { %227 = vperm.xlu0 %286, %v60_v2  }
  0x48   :  { %181 = vperm.xlu1 %283, %v60_v2   ;;  %207 = vrot.lane.b32.xlu2 %v446_v4, %s409_s4 }
  0x50   :  { %284 = vset.pattern.permute.xlu1 %v412_v12  ;;  %219 = vperm.xlu2 %285, %v60_v2  }
  0x51   :  { %200 = vperm.xlu1 %284, %v60_v2  }
  0x6a   :  { %v94_v13 = vpop.permute.xlu2 %93 }
  0x72   :  { %v96_v14 = vpop.permute.xlu2 %95 }
  0x73   :  { %v98_v40 = vsel %vm97_vm1, %v94_v13, %v96_v14  ;;  %v99_v41 = vsel %vm97_vm1, %v96_v14, %v94_v13 }
  0x74   :  { %v102_v45 = vmul.f32 %v100_v38, %v99_v41  ;;  %v103_v46 = vmul.f32 %v101_v39, %v98_v40  ;;  %v287_v41 = vld [vmem:[#allocation7 + $0x10] ss:$0 sm:$0xff] }
  0x7a   :  { %v115_v17 = vpop.permute.xlu2 %114 }
  0x81   :  { %v75_v15 = vpop.permute.xlu1 %74  ;;  %v68_v16 = vpop.permute.xlu0 %67 }
  0x82   :  { %v132_v21 = vpop.permute.xlu2 %131  ;;  %v70_v49 = vmul.f32 %v68_v16, %v446_v4  ;;  %v71_v50 = vmul.f32 %v68_v16, %v443_v3  ;;  %v177_v16 = vperm.slane %v472_v31, 6 }
  0x89   :  { %v87_v18 = vpop.permute.xlu1 %86  ;;  %v73_v19 = vpop.permute.xlu0 %72 }
  0x8a   :  { %v151_v24 = vpop.permute.xlu2 %150  ;;  %v79_v36 = vsel %vm78_vm0, %v73_v19, %v75_v15  ;;  %v80_v37 = vsel %vm78_vm0, %v75_v15, %v73_v19  ;;  %v176_v15 = vperm.slane %v470_v30, 6 }
  0x8b   :  { %v83_v42 = vmul.f32 %v81_v34, %v80_v37  ;;  %v84_v43 = vmul.f32 %v82_v35, %v79_v36  ;;  %v196_v36 = vperm.slane %v472_v31, 7 }
  0x8d   :  { %v89_v52 = vmul.f32 %v87_v18, %v83_v42  ;;  %v90_v53 = vmul.f32 %v87_v18, %v84_v43  ;;  %v288_v42 = vld [vmem:[#allocation7 + $0x18] ss:$0 sm:$0xff] }
  0x8f   :  { %v92_v7 = vadd.f32 %v90_v53, %v71_v50  ;;  %v91_v8 = vadd.f32 %v89_v52, %v70_v49 }
  0x91   :  { %v113_v20 = vpop.permute.xlu1 %112  ;;  %v106_v22 = vpop.permute.xlu0 %105 }
  0x92   :  { %v465_v28 = vpop.permute.xlu2 %171  ;;  %v117_v54 = vsel %vm116_vm2, %v113_v20, %v115_v17  ;;  %v118_v55 = vsel %vm116_vm2, %v115_v17, %v113_v20  ;;  %v108_v61 = vmul.f32 %v106_v22, %v102_v45  ;;  %v109_v62 = vmul.f32 %v106_v22, %v103_v46 }
  0x93   :  { %v121_v1 = vmul.f32 %v119_v47, %v118_v55  ;;  %v122_v2 = vmul.f32 %v120_v48, %v117_v54 }
  0x94   :  { %v110_v18 = vadd.f32 %v108_v61, %v91_v8  ;;  %v111_v19 = vadd.f32 %v109_v62, %v92_v7 }
  0x99   :  { %v125_v23 = vpop.permute.xlu1 %124  ;;  %v134_v25 = vpop.permute.xlu0 %133 }
  0x9a   :  { %v479_v44 = vpop.permute.xlu2 %190  ;;  %v136_v63 = vsel %vm135_vm3, %v132_v21, %v134_v25  ;;  %v137_v0 = vsel %vm135_vm3, %v134_v25, %v132_v21  ;;  %v127_v9 = vmul.f32 %v125_v23, %v121_v1  ;;  %v128_v10 = vmul.f32 %v125_v23, %v122_v2 }
  0x9b   :  { %v140_v11 = vmul.f32 %v138_v56, %v137_v0  ;;  %v141_v12 = vmul.f32 %v139_v57, %v136_v63 }
  0x9c   :  { %v129_v25 = vadd.f32 %v127_v9, %v110_v18  ;;  %v130_v27 = vadd.f32 %v128_v10, %v111_v19 }
  0xa1   :  { %v153_v32 = vpop.permute.xlu0 %152 }
  0xa2   :  { %v463_v26 = vpop.permute.xlu1 %143  ;;  %v155_v5 = vsel %vm154_vm4, %v151_v24, %v153_v32  ;;  %v156_v6 = vsel %vm154_vm4, %v153_v32, %v151_v24  ;;  %v208_v17 = vpop.permute.xlu2 %207 }
  0xa3   :  { %v159_v13 = vmul.f32 %v157_v58, %v155_v5  ;;  %v160_v14 = vmul.f32 %v158_v59, %v156_v6  ;;  %v146_v20 = vmul.f32 %v463_v26, %v140_v11  ;;  %v147_v21 = vmul.f32 %v463_v26, %v141_v12 }
  0xa4   :  { %v195_v26 = vperm.slane %v470_v30, 7 }
  0xa5   :  { %v148_v37 = vadd.f32 %v146_v20, %v129_v25  ;;  %v149_v38 = vadd.f32 %v147_v21, %v130_v27 }
  0xa9   :  { %v163_v60 = vpop.permute.xlu0 %162 }
  0xaa   :  { %v170_v33 = vpop.permute.xlu1 %169  ;;  %v165_v34 = vmul.f32 %v163_v60, %v159_v13  ;;  %v166_v35 = vmul.f32 %v163_v60, %v160_v14  ;;  %v220_v52 = vpop.permute.xlu2 %219 }
  0xab   :  { %v174_v23 = vsel %vm173_vm5, %v170_v33, %v465_v28  ;;  %v175_v24 = vsel %vm173_vm5, %v465_v28, %v170_v33 }
  0xac   :  { %v178_v39 = vmul.f32 %v176_v15, %v174_v23  ;;  %v179_v40 = vmul.f32 %v177_v16, %v175_v24  ;;  %v167_v47 = vadd.f32 %v165_v34, %v148_v37  ;;  %v168_v48 = vadd.f32 %v166_v35, %v149_v38 }
  0xb1   :  { %v210_v32 = vpop.permute.xlu0 %209 }
  0xb2   :  { %v189_v51 = vpop.permute.xlu1 %188  ;;  %v212_v43 = vsel %vm211_vm7, %v208_v17, %v210_v32  ;;  %v213_v45 = vsel %vm211_vm7, %v210_v32, %v208_v17 }
  0xb3   :  { %v193_v28 = vsel %vm192_vm6, %v189_v51, %v479_v44  ;;  %v194_v33 = vsel %vm192_vm6, %v479_v44, %v189_v51  ;;  %v216_v49 = vmul.f32 %v287_v41, %v212_v43  ;;  %v217_v30 = vmul.f32 %v288_v42, %v213_v45 }
  0xb4   :  { %v197_v50 = vmul.f32 %v195_v26, %v193_v28  ;;  %v198_v31 = vmul.f32 %v196_v36, %v194_v33 }
  0xb5   :  { %v222_v58 = vmul.f32 %v220_v52, %v216_v49  ;;  %v223_v59 = vmul.f32 %v220_v52, %v217_v30 }
  0xb9   :  { %v228_v51 = vpop.permute.xlu0 %227 }
  0xba   :  { %v182_v22 = vpop.permute.xlu1 %181 }
  0xbb   :  { %v184_v29 = vmul.f32 %v182_v22, %v178_v39  ;;  %v185_v46 = vmul.f32 %v182_v22, %v179_v40 }
  0xbd   :  { %v186_v54 = vadd.f32 %v184_v29, %v167_v47  ;;  %v187_v55 = vadd.f32 %v185_v46, %v168_v48 }
  0xc3   :  { %v201_v53 = vpop.permute.xlu1 %200 }
  0xc4   :  { %v203_v56 = vmul.f32 %v201_v53, %v197_v50  ;;  %v204_v57 = vmul.f32 %v201_v53, %v198_v31 }
  0xc6   :  { %v205_v60 = vadd.f32 %v203_v56, %v186_v54  ;;  %v206_v44 = vadd.f32 %v204_v57, %v187_v55 }
  0xc8   :  { %v225_v61 = vadd.f32 %v223_v59, %v206_v44  ;;  %v224_v62 = vadd.f32 %v222_v58, %v205_v60 }
  0xca   :  { %v230_v63 = vadd.f32 %v228_v51, %v224_v62  ;;  %v231_v0 = vadd.f32 %v228_v51, %v225_v61 }
  0xcc   :  { %v232_v1 = vmax.f32 %v446_v4, %v230_v63  ;;  %v233_v2 = vmax.f32 %v443_v3, %v231_v0 }
  0xce   :  { %234 = vst [vmem:[#allocation8] sm:$0xff] %v232_v1 }
  0xcf   :  { %235 = vst [vmem:[#allocation8 + $0x8] sm:$0xff] %v233_v2 }
  0xd0   :  { %246 = dma.vmem_to_hbm [thread:$0]  %s242_s7, 256, %s244_s10, [#allocation4]  }
  0xd1   :  { %389 = dma.done.wait [#allocation4], 256  }
  0xd2   :  { %390 = vsyncadd [#allocation4], 4294967040 }
  0xd3   :  { %251 = vsyncpa [#allocation3], 1 }
  0xd4   :  { %252 = vsyncpa [#allocation6], 1 }
  0xd5   :  { %253 = vsyncpa [#allocation4], 1 }

</bundles_post_ra>
